<compile_context>
chip_gen: v6e
topology: v6e:2x2x1
jax: 0.10.0
libtpu: 0.0.40
codegen_flags: <defaults>
</compile_context>

<pallas_src>
import functools
import math

import jax
import jax.numpy as jnp
from jax.experimental import pallas as pl
from jax.experimental.pallas import tpu as pltpu


def _round_up(x, m):
    return ((x + m - 1) // m) * m


def _cgru_seq_kernel(hidden_dim, output_dim,
                     h0_ref,    # (1, H)         initial hidden state
                     xc_ref,    # (T, XCP)       per-step packed [x_t | c_t | 1 | 0pad]
                     wxc_ref,   # (XCP, 6H)      resident, ctx_wt + gate biases folded in
                     wh_ref,    # (H, 3H)        resident, (1-ctx_wt) folded in
                     wo_ref,    # (H+1, out)     resident, h2o bias = last row
                     out_ref,   # (T, OUTP)      resident output slab, written back once
                     h_ref,     # VMEM (1, H)    hidden-state carry
                     row_ref):  # VMEM (1, OUTP) staging row (keeps pad lanes zero)
    H = hidden_dim
    t = pl.program_id(0)

    @pl.when(t == 0)
    def _():
        h_ref[...] = h0_ref[...]
        row_ref[...] = jnp.zeros_like(row_ref)   # one-time memset -> pad lanes are 0

    h = h_ref[...]                                # (1, H)
    xc = xc_ref[pl.ds(t, 1), :]                   # (1, XCP) current step's [x | c | 1]

    # Fused gate GEMMs: gx | gh_context from one slab, hidden contribution separate.
    g = jnp.dot(xc, wxc_ref[...], preferred_element_type=jnp.float32)        # (1, 6H)
    gx = g[:, 0:3 * H]
    gh = g[:, 3 * H:6 * H] + jnp.dot(h, wh_ref[...],
                                     preferred_element_type=jnp.float32)     # (1, 3H)

    # reset + input gates with one contiguous sigmoid over 2H lanes.
    ri = jax.nn.sigmoid(gx[:, 0:2 * H] + gh[:, 0:2 * H])
    resetgate = ri[:, 0:H]
    inputgate = ri[:, H:2 * H]
    newgate = jnp.tanh(gx[:, 2 * H:3 * H] + resetgate * gh[:, 2 * H:3 * H])
    h_t = newgate + inputgate * (h - newgate)
    h_ref[...] = h_t                              # carry for next step (never leaves VMEM)

    # TODO(synk): h2o_dropout is identity at inference; training-mode stochastic
    # dropout is not reproduced here.
    a_t = jax.nn.sigmoid(
        jnp.dot(h_t, wo_ref[0:H, :], preferred_element_type=jnp.float32)
        + wo_ref[H:H + 1, :])                     # (1, out), bias row folded into wo

    # Packed output row: [ri (2H) | newgate (H) | h_t (H) | a_t | 0pad]; a_t is
    # 128-aligned.  Static-slice stores into the staging row, one full-width
    # store into the slab at dynamic row t.
    row_ref[:, 0:2 * H] = ri
    row_ref[:, 2 * H:3 * H] = newgate
    row_ref[:, 3 * H:4 * H] = h_t
    row_ref[:, 4 * H:4 * H + output_dim] = a_t
    out_ref[pl.ds(t, 1), :] = row_ref[...]


def pack_cgru_params(params, *, ctx_wt, input_dim, hidden_dim, context_dim):
    """Fold ctx_wt/biases into the weights and fuse the gate linears.

    Returns:
      w_xc: (XCP, 6H)  rows = [x | context | fused-bias | 0pad]; cols 0:3H are
            gate_x, cols 3H:6H are the context/bias part of gate_h.
      w_h : (H, 3H)    hidden -> gate_h, pre-scaled by (1 - ctx_wt).
      w_o : (H+1, out) h2o weight with its bias as the last row.
    """
    H = hidden_dim
    one_m = 1.0 - ctx_wt
    XCP = _round_up(input_dim + context_dim + 1, 8)

    w_xc = jnp.zeros((XCP, 6 * H), dtype=jnp.float32)
    w_xc = w_xc.at[0:input_dim, 0:3 * H].set(params["w_i2h"] * one_m)
    c0 = input_dim
    w_xc = w_xc.at[c0:c0 + context_dim, 0:3 * H].set(params["w_ci2h"] * ctx_wt)
    w_xc = w_xc.at[c0:c0 + context_dim, 3 * H:6 * H].set(params["w_ch2h"] * ctx_wt)
    b_row = input_dim + context_dim                       # the state row carries a 1 here
    w_xc = w_xc.at[b_row, 0:3 * H].set(
        (params["b_i2h"] * one_m + params["b_ci2h"] * ctx_wt)[0])
    w_xc = w_xc.at[b_row, 3 * H:6 * H].set(
        (params["b_h2h"] * one_m + params["b_ch2h"] * ctx_wt)[0])

    w_h = (params["w_h2h"] * one_m).astype(jnp.float32)                     # (H, 3H)
    w_o = jnp.concatenate([params["w_h2o"], params["b_h2o"]],
                          axis=0).astype(jnp.float32)                       # (H+1, out)
    return {"w_xc": w_xc, "w_h": w_h, "w_o": w_o}


@functools.partial(
    jax.jit,
    static_argnames=("input_dim", "hidden_dim", "output_dim", "context_dim"))
def cgru_sequence(packed, x_seq, h0, context_seq, *,
                  input_dim, hidden_dim, output_dim, context_dim):
    """Run T CGRU steps in one fused kernel.

    Returns ((a_seq, h_seq), (resetgate, inputgate, newgate)) with leading dim T.
    """
    H = hidden_dim
    T = x_seq.shape[0]
    XCP = _round_up(input_dim + context_dim + 1, 8)
    used = 4 * H + output_dim
    OUTP = max(128, _round_up(used, 128))                 # lane-dense output slab

    x_seq = x_seq.reshape(T, input_dim).astype(jnp.float32)
    context_seq = context_seq.reshape(T, context_dim).astype(jnp.float32)
    h0 = h0.reshape(1, H).astype(jnp.float32)

    # Packed per-step rows [x_t | c_t | 1 | 0pad] (the trailing 1 picks up the
    # fused bias row of w_xc).
    xc = jnp.zeros((T, XCP), jnp.float32)
    xc = xc.at[:, 0:input_dim].set(x_seq)
    xc = xc.at[:, input_dim:input_dim + context_dim].set(context_seq)
    xc = xc.at[:, input_dim + context_dim].set(1.0)

    kernel = functools.partial(_cgru_seq_kernel, int(H), int(output_dim))
    const2 = lambda t: (0, 0)                             # resident across all steps

    slab = pl.pallas_call(
        kernel,
        out_shape=jax.ShapeDtypeStruct((T, OUTP), jnp.float32),
        grid=(T,),
        in_specs=[
            pl.BlockSpec((1, H), const2),                 # h0
            pl.BlockSpec((T, XCP), const2),               # packed x/context sequence
            pl.BlockSpec((XCP, 6 * H), const2),           # w_xc  (resident)
            pl.BlockSpec((H, 3 * H), const2),             # w_h   (resident)
            pl.BlockSpec((H + 1, output_dim), const2),    # w_o   (resident, bias row)
        ],
        out_specs=pl.BlockSpec((T, OUTP), const2),        # resident, one writeback
        scratch_shapes=[pltpu.VMEM((1, H), jnp.float32),      # hidden carry
                        pltpu.VMEM((1, OUTP), jnp.float32)],  # staging row
        compiler_params=pltpu.CompilerParams(
            dimension_semantics=("arbitrary",)),
    )(h0, xc, packed["w_xc"], packed["w_h"], packed["w_o"])

    ri = slab[:, 0:2 * H]
    resetgate = ri[:, 0:H]
    inputgate = ri[:, H:2 * H]
    newgate = slab[:, 2 * H:3 * H]
    h_seq = slab[:, 3 * H:4 * H]
    a_seq = slab[:, 4 * H:4 * H + output_dim]
    return (a_seq, h_seq), (resetgate, inputgate, newgate)


def cgru_step(packed, x, hidden, context, *,
              input_dim, hidden_dim, output_dim, context_dim):
    """Single CGRU step (parity with the PyTorch module's forward)."""
    return cgru_sequence(packed, x.reshape(1, -1), hidden.reshape(-1),
                         context.reshape(1, -1),
                         input_dim=input_dim, hidden_dim=hidden_dim,
                         output_dim=output_dim, context_dim=context_dim)


def init_cgru_params(key, input_dim, hidden_dim, output_dim, context_dim):
    """Deterministic init matching reset_parameters: U(-1/sqrt(H), 1/sqrt(H)).

    Weights stored "math style" (in_dim, out_dim); biases (1, out_dim).
    """
    std = 1.0 / math.sqrt(hidden_dim)
    shapes = {
        "w_i2h": (input_dim, 3 * hidden_dim),
        "b_i2h": (1, 3 * hidden_dim),
        "w_h2h": (hidden_dim, 3 * hidden_dim),
        "b_h2h": (1, 3 * hidden_dim),
        "w_ci2h": (context_dim, 3 * hidden_dim),
        "b_ci2h": (1, 3 * hidden_dim),
        "w_ch2h": (context_dim, 3 * hidden_dim),
        "b_ch2h": (1, 3 * hidden_dim),
        "w_h2o": (hidden_dim, output_dim),
        "b_h2o": (1, output_dim),
    }
    params = {}
    keys = jax.random.split(key, len(shapes))
    for k, (name, shape) in zip(keys, shapes.items()):
        params[name] = jax.random.uniform(
            k, shape, minval=-std, maxval=std, dtype=jnp.float32)
    return params


def cgru_reference_step(params, x, hidden, context, *, ctx_wt, hidden_dim):
    """Pure-JAX single step mirroring the PyTorch forward (eval-mode dropout)."""
    x = x.reshape(1, -1)
    hidden = hidden.reshape(1, -1)
    context = context.reshape(1, -1)
    gate_x = (x @ params["w_i2h"] + params["b_i2h"]) * (1 - ctx_wt) + \
             (context @ params["w_ci2h"] + params["b_ci2h"]) * ctx_wt
    gate_h = (hidden @ params["w_h2h"] + params["b_h2h"]) * (1 - ctx_wt) + \
             (context @ params["w_ch2h"] + params["b_ch2h"]) * ctx_wt
    H = hidden_dim
    i_r, i_i, i_n = gate_x[:, :H], gate_x[:, H:2 * H], gate_x[:, 2 * H:]
    h_r, h_i, h_n = gate_h[:, :H], gate_h[:, H:2 * H], gate_h[:, 2 * H:]
    resetgate = jax.nn.sigmoid(i_r + h_r)
    inputgate = jax.nn.sigmoid(i_i + h_i)
    newgate = jnp.tanh(i_n + resetgate * h_n)
    h_t = newgate + inputgate * (hidden - newgate)
    a_t = jax.nn.sigmoid(h_t @ params["w_h2o"] + params["b_h2o"])
    return a_t, h_t, resetgate, inputgate, newgate


if __name__ == "__main__":
    input_dim, hidden_dim, output_dim, context_dim = 16, 32, 4, 8
    T = 8
    ctx_wt = 0.5

    key = jax.random.PRNGKey(0)
    kp, kx, kh, kc = jax.random.split(key, 4)

    params = init_cgru_params(kp, input_dim, hidden_dim, output_dim, context_dim)
    packed = pack_cgru_params(params, ctx_wt=ctx_wt, input_dim=input_dim,
                              hidden_dim=hidden_dim, context_dim=context_dim)

    x_seq = jax.random.normal(kx, (T, input_dim), dtype=jnp.float32)
    h0 = jax.random.normal(kh, (hidden_dim,), dtype=jnp.float32) * 0.1
    ctx_seq = jax.random.normal(kc, (T, context_dim), dtype=jnp.float32)

    (a_seq, h_seq), (rg_seq, ig_seq, ng_seq) = cgru_sequence(
        packed, x_seq, h0, ctx_seq,
        input_dim=input_dim, hidden_dim=hidden_dim,
        output_dim=output_dim, context_dim=context_dim)
    jax.block_until_ready((a_seq, h_seq, rg_seq, ig_seq, ng_seq))

    # Step-by-step pure-JAX reference of the full recurrence.
    h = h0.reshape(1, -1)
    for t in range(T):
        a_r, h_r, rg_r, ig_r, ng_r = cgru_reference_step(
            params, x_seq[t], h, ctx_seq[t], ctx_wt=ctx_wt, hidden_dim=hidden_dim)
        assert jnp.allclose(a_seq[t], a_r[0], atol=1e-4), f"a_t mismatch @ step {t}"
        assert jnp.allclose(h_seq[t], h_r[0], atol=1e-4), f"h_t mismatch @ step {t}"
        assert jnp.allclose(rg_seq[t], rg_r[0], atol=1e-4), f"resetgate mismatch @ step {t}"
        assert jnp.allclose(ig_seq[t], ig_r[0], atol=1e-4), f"inputgate mismatch @ step {t}"
        assert jnp.allclose(ng_seq[t], ng_r[0], atol=1e-4), f"newgate mismatch @ step {t}"
        h = h_r

    # Exercise the single-step API (module.forward parity) on step 0.
    (a0, h0_t), _ = cgru_step(packed, x_seq[0], h0, ctx_seq[0],
                              input_dim=input_dim, hidden_dim=hidden_dim,
                              output_dim=output_dim, context_dim=context_dim)
    jax.block_until_ready((a0, h0_t))
    a_r0, h_r0, *_ = cgru_reference_step(
        params, x_seq[0], h0, ctx_seq[0], ctx_wt=ctx_wt, hidden_dim=hidden_dim)
    assert jnp.allclose(a0, a_r0, atol=1e-4), "single-step a_t mismatch"
    assert jnp.allclose(h0_t, h_r0, atol=1e-4), "single-step h_t mismatch"

    print("KERNEL_OK")
</pallas_src>

<mosaic_0001>
module attributes {stable_mosaic.version = 11 : i64} {
  func.func @_cgru_seq_kernel(%arg0: i32, %arg1: memref<1x32xf32, #tpu.memory_space<vmem>>, %arg2: memref<8x32xf32, #tpu.memory_space<vmem>>, %arg3: memref<32x192xf32, #tpu.memory_space<vmem>>, %arg4: memref<32x96xf32, #tpu.memory_space<vmem>>, %arg5: memref<33x4xf32, #tpu.memory_space<vmem>>, %arg6: memref<8x256xf32, #tpu.memory_space<vmem>>, %arg7: memref<1x32xf32, #tpu.memory_space<vmem>>, %arg8: memref<1x256xf32, #tpu.memory_space<vmem>>) attributes {dimension_semantics = [#tpu.dimension_semantics<arbitrary>], iteration_bounds = array<i64: 8>, scalar_prefetch = 0 : i64, scratch_operands = 2 : i64, tpu.core_type = #tpu.core_type<tc>, window_params = [{pipeline_mode = #tpu.pipeline_mode<synchronous>, transform_indices = @transform_0, window_bounds = array<i64: 1, 32>}, {pipeline_mode = #tpu.pipeline_mode<synchronous>, transform_indices = @transform_1, window_bounds = array<i64: 8, 32>}, {pipeline_mode = #tpu.pipeline_mode<synchronous>, transform_indices = @transform_2, window_bounds = array<i64: 32, 192>}, {pipeline_mode = #tpu.pipeline_mode<synchronous>, transform_indices = @transform_3, window_bounds = array<i64: 32, 96>}, {pipeline_mode = #tpu.pipeline_mode<synchronous>, transform_indices = @transform_4, window_bounds = array<i64: 33, 4>}, {pipeline_mode = #tpu.pipeline_mode<synchronous>, transform_indices = @transform_5, window_bounds = array<i64: 8, 256>}]} {
    %c0_i32 = arith.constant 0 : i32
    %0 = arith.cmpi eq, %arg0, %c0_i32 : i32
    %1 = arith.extui %0 : i1 to i32
    %c0_i32_0 = arith.constant 0 : i32
    %2 = arith.cmpi ne, %1, %c0_i32_0 : i32
    scf.if %2 {
      %c0_24 = arith.constant 0 : index
      %c0_25 = arith.constant 0 : index
      %48 = vector.load %arg1[%c0_24, %c0_25] : memref<1x32xf32, #tpu.memory_space<vmem>>, vector<1x32xf32>
      %c0_26 = arith.constant 0 : index
      %c0_27 = arith.constant 0 : index
      %49 = vector.load %arg7[%c0_26, %c0_27] : memref<1x32xf32, #tpu.memory_space<vmem>>, vector<1x32xf32>
      tpu.vector_store %arg7[%c0_26, %c0_27], %48 {strides = array<i32>} : memref<1x32xf32, #tpu.memory_space<vmem>>, vector<1x32xf32>,
      %cst_28 = arith.constant 0.000000e+00 : f32
      %50 = vector.broadcast %cst_28 : f32 to vector<1x256xf32>
      %c0_29 = arith.constant 0 : index
      %c0_30 = arith.constant 0 : index
      %51 = vector.load %arg8[%c0_29, %c0_30] : memref<1x256xf32, #tpu.memory_space<vmem>>, vector<1x256xf32>
      tpu.vector_store %arg8[%c0_29, %c0_30], %50 {strides = array<i32>} : memref<1x256xf32, #tpu.memory_space<vmem>>, vector<1x256xf32>,
    } else {
    }
    %c0 = arith.constant 0 : index
    %c0_1 = arith.constant 0 : index
    %3 = vector.load %arg7[%c0, %c0_1] : memref<1x32xf32, #tpu.memory_space<vmem>>, vector<1x32xf32>
    %4 = arith.index_cast %arg0 : i32 to index
    %c0_2 = arith.constant 0 : index
    %5 = vector.load %arg2[%4, %c0_2] : memref<8x32xf32, #tpu.memory_space<vmem>>, vector<1x32xf32>
    %c0_3 = arith.constant 0 : index
    %c0_4 = arith.constant 0 : index
    %6 = vector.load %arg3[%c0_3, %c0_4] : memref<32x192xf32, #tpu.memory_space<vmem>>, vector<32x192xf32>
    %cst = arith.constant dense<0.000000e+00> : vector<1x192xf32>
    %7 = tpu.matmul %5, %6, %cst {dimension_numbers = #tpu.dot_dimension_numbers<[1], [0], [0], [1], [0, 0, 1, 1], [], []>} : vector<1x32xf32>, vector<32x192xf32>, vector<1x192xf32> -> vector<1x192xf32>
    %8 = vector.extract_strided_slice %7 {offsets = [0, 0], sizes = [1, 96], strides = [1, 1]} : vector<1x192xf32> to vector<1x96xf32>
    %9 = vector.extract_strided_slice %7 {offsets = [0, 96], sizes = [1, 96], strides = [1, 1]} : vector<1x192xf32> to vector<1x96xf32>
    %c0_5 = arith.constant 0 : index
    %c0_6 = arith.constant 0 : index
    %10 = vector.load %arg4[%c0_5, %c0_6] : memref<32x96xf32, #tpu.memory_space<vmem>>, vector<32x96xf32>
    %cst_7 = arith.constant dense<0.000000e+00> : vector<1x96xf32>
    %11 = tpu.matmul %3, %10, %cst_7 {dimension_numbers = #tpu.dot_dimension_numbers<[1], [0], [0], [1], [0, 0, 1, 1], [], []>} : vector<1x32xf32>, vector<32x96xf32>, vector<1x96xf32> -> vector<1x96xf32>
    %12 = arith.addf %9, %11 : vector<1x96xf32>
    %13 = vector.extract_strided_slice %8 {offsets = [0, 0], sizes = [1, 64], strides = [1, 1]} : vector<1x96xf32> to vector<1x64xf32>
    %14 = vector.extract_strided_slice %12 {offsets = [0, 0], sizes = [1, 64], strides = [1, 1]} : vector<1x96xf32> to vector<1x64xf32>
    %15 = arith.addf %13, %14 : vector<1x64xf32>
    %16 = arith.negf %15 : vector<1x64xf32>
    %17 = math.exp %16 : vector<1x64xf32>
    %cst_8 = arith.constant 1.000000e+00 : f32
    %18 = vector.broadcast %cst_8 : f32 to vector<1x64xf32>
    %19 = arith.addf %18, %17 : vector<1x64xf32>
    %20 = arith.divf %18, %19 : vector<1x64xf32>
    %21 = vector.extract_strided_slice %20 {offsets = [0, 0], sizes = [1, 32], strides = [1, 1]} : vector<1x64xf32> to vector<1x32xf32>
    %22 = vector.extract_strided_slice %20 {offsets = [0, 32], sizes = [1, 32], strides = [1, 1]} : vector<1x64xf32> to vector<1x32xf32>
    %23 = vector.extract_strided_slice %8 {offsets = [0, 64], sizes = [1, 32], strides = [1, 1]} : vector<1x96xf32> to vector<1x32xf32>
    %24 = vector.extract_strided_slice %12 {offsets = [0, 64], sizes = [1, 32], strides = [1, 1]} : vector<1x96xf32> to vector<1x32xf32>
    %25 = arith.mulf %21, %24 : vector<1x32xf32>
    %26 = arith.addf %23, %25 : vector<1x32xf32>
    %27 = math.tanh %26 : vector<1x32xf32>
    %28 = arith.subf %3, %27 : vector<1x32xf32>
    %29 = arith.mulf %22, %28 : vector<1x32xf32>
    %30 = arith.addf %27, %29 : vector<1x32xf32>
    %c0_9 = arith.constant 0 : index
    %c0_10 = arith.constant 0 : index
    %31 = vector.load %arg7[%c0_9, %c0_10] : memref<1x32xf32, #tpu.memory_space<vmem>>, vector<1x32xf32>
    tpu.vector_store %arg7[%c0_9, %c0_10], %30 {strides = array<i32>} : memref<1x32xf32, #tpu.memory_space<vmem>>, vector<1x32xf32>,
    %c0_11 = arith.constant 0 : index
    %c0_12 = arith.constant 0 : index
    %32 = vector.load %arg5[%c0_11, %c0_12] : memref<33x4xf32, #tpu.memory_space<vmem>>, vector<32x4xf32>
    %cst_13 = arith.constant dense<0.000000e+00> : vector<1x4xf32>
    %33 = tpu.matmul %30, %32, %cst_13 {dimension_numbers = #tpu.dot_dimension_numbers<[1], [0], [0], [1], [0, 0, 1, 1], [], []>} : vector<1x32xf32>, vector<32x4xf32>, vector<1x4xf32> -> vector<1x4xf32>
    %c32 = arith.constant 32 : index
    %c0_14 = arith.constant 0 : index
    %34 = vector.load %arg5[%c32, %c0_14] : memref<33x4xf32, #tpu.memory_space<vmem>>, vector<1x4xf32>
    %35 = arith.addf %33, %34 : vector<1x4xf32>
    %36 = arith.negf %35 : vector<1x4xf32>
    %37 = math.exp %36 : vector<1x4xf32>
    %cst_15 = arith.constant 1.000000e+00 : f32
    %38 = vector.broadcast %cst_15 : f32 to vector<1x4xf32>
    %39 = arith.addf %38, %37 : vector<1x4xf32>
    %40 = arith.divf %38, %39 : vector<1x4xf32>
    %c0_16 = arith.constant 0 : index
    %c0_17 = arith.constant 0 : index
    %41 = vector.load %arg8[%c0_16, %c0_17] : memref<1x256xf32, #tpu.memory_space<vmem>>, vector<1x64xf32>
    tpu.vector_store %arg8[%c0_16, %c0_17], %20 {strides = array<i32>} : memref<1x256xf32, #tpu.memory_space<vmem>>, vector<1x64xf32>,
    %c0_18 = arith.constant 0 : index
    %c64 = arith.constant 64 : index
    %42 = vector.load %arg8[%c0_18, %c64] : memref<1x256xf32, #tpu.memory_space<vmem>>, vector<1x32xf32>
    tpu.vector_store %arg8[%c0_18, %c64], %27 {strides = array<i32>} : memref<1x256xf32, #tpu.memory_space<vmem>>, vector<1x32xf32>,
    %c0_19 = arith.constant 0 : index
    %c96 = arith.constant 96 : index
    %43 = vector.load %arg8[%c0_19, %c96] : memref<1x256xf32, #tpu.memory_space<vmem>>, vector<1x32xf32>
    tpu.vector_store %arg8[%c0_19, %c96], %30 {strides = array<i32>} : memref<1x256xf32, #tpu.memory_space<vmem>>, vector<1x32xf32>,
    %c0_20 = arith.constant 0 : index
    %c128 = arith.constant 128 : index
    %44 = vector.load %arg8[%c0_20, %c128] : memref<1x256xf32, #tpu.memory_space<vmem>>, vector<1x4xf32>
    tpu.vector_store %arg8[%c0_20, %c128], %40 {strides = array<i32>} : memref<1x256xf32, #tpu.memory_space<vmem>>, vector<1x4xf32>,
    %c0_21 = arith.constant 0 : index
    %c0_22 = arith.constant 0 : index
    %45 = vector.load %arg8[%c0_21, %c0_22] : memref<1x256xf32, #tpu.memory_space<vmem>>, vector<1x256xf32>
    %46 = arith.index_cast %arg0 : i32 to index
    %c0_23 = arith.constant 0 : index
    %47 = vector.load %arg6[%46, %c0_23] : memref<8x256xf32, #tpu.memory_space<vmem>>, vector<1x256xf32>
    tpu.vector_store %arg6[%46, %c0_23], %45 {strides = array<i32>} : memref<8x256xf32, #tpu.memory_space<vmem>>, vector<1x256xf32>,
    return
  }
  func.func @transform_0(%arg0: i32) -> (i32, i32) {
    %c0_i32 = arith.constant 0 : i32
    %c0_i32_0 = arith.constant 0 : i32
    %c0_i32_1 = arith.constant 0 : i32
    return %c0_i32, %c0_i32_0 : i32, i32
  }
  func.func @transform_1(%arg0: i32) -> (i32, i32) {
    %c0_i32 = arith.constant 0 : i32
    %c0_i32_0 = arith.constant 0 : i32
    %c0_i32_1 = arith.constant 0 : i32
    return %c0_i32, %c0_i32_0 : i32, i32
  }
  func.func @transform_2(%arg0: i32) -> (i32, i32) {
    %c0_i32 = arith.constant 0 : i32
    %c0_i32_0 = arith.constant 0 : i32
    %c0_i32_1 = arith.constant 0 : i32
    return %c0_i32, %c0_i32_0 : i32, i32
  }
  func.func @transform_3(%arg0: i32) -> (i32, i32) {
    %c0_i32 = arith.constant 0 : i32
    %c0_i32_0 = arith.constant 0 : i32
    %c0_i32_1 = arith.constant 0 : i32
    return %c0_i32, %c0_i32_0 : i32, i32
  }
  func.func @transform_4(%arg0: i32) -> (i32, i32) {
    %c0_i32 = arith.constant 0 : i32
    %c0_i32_0 = arith.constant 0 : i32
    %c0_i32_1 = arith.constant 0 : i32
    return %c0_i32, %c0_i32_0 : i32, i32
  }
  func.func @transform_5(%arg0: i32) -> (i32, i32) {
    %c0_i32 = arith.constant 0 : i32
    %c0_i32_0 = arith.constant 0 : i32
    %c0_i32_1 = arith.constant 0 : i32
    return %c0_i32, %c0_i32_0 : i32, i32
  }
}

</mosaic_0001>

<bundles_post_ra>
// kernel: cgru_sequence.1
= control target key start
LH: loop header
LB: loop body
LE: loop exit
PB: predicated region body
PF: predicated region fallthrough
CT: control target
= control target key end

     0   :  { %s700_s18 = smov 0   ;;  %s814_s0 = inlined_call_operand.vmem [shape: f32[1,32], index: 0, kind: input, shape index: {}]   ;;  %s815_s1 = inlined_call_operand.vmem [shape: f32[8,32], index: 1, kind: input, shape index: {}]   ;;  %s816_s2 = inlined_call_operand.vmem [shape: f32[32,192], index: 2, kind: input, shape index: {}]   ;;  %s817_s3 = inlined_call_operand.vmem [shape: f32[32,96], index: 3, kind: input, shape index: {}]   ;;  %s818_s4 = inlined_call_operand.vmem [shape: f32[33,4], index: 4, kind: input, shape index: {}]   ;;  %s819_s5 = inlined_call_operand.vmem [shape: f32[8,256], index: 5, kind: output, shape index: {}]  }
   0x1 LB: > { %s706_s19 = sadd.s32 4294967295, %s661_s18   ;;  %p586_p0 = scmp.ge.s32.totalorder %s661_s18, 1  ;;  %s661_s18 = sphi %s700_s18, %s15_s18  }
   0x2   : > { %p172_p1 = scmp.lt.s32.totalorder %s661_s18, 9 }
   0x4   : > { %p173_p2 = pnand %p586_p0, %p172_p1 }
   0x5   : > { %p587_p3 = scmp.ne.s32.totalorder (!%p173_p2), %s706_s19, 0 }
   0x6   : > { %176 = sbr.rel (%p173_p2) target bundleno = 1330 (0x532), region = 40 }
   0xb   : > { %193 = sbr.rel (%p587_p3) target bundleno = 20 (0x14), region = 44 }
  0x10   : > { %v194_v0 = vld [vmem:[%s814_s0] sm:$0x1]  ;;  %vm195_vm0 = vcmask 253952   ;;  %v197_v1 = vlaneseq  ;;  %v663_v2 = vmov 0.0  }
  0x11   : > { %196 = vst.msk [vmem:[#allocation2] sm:$0x1] %vm195_vm0, %v194_v0 }
  0x12   : > { %vm199_vm1 = vcmp.lt.s32.totalorder %v197_v1, 256 }
  0x13   : > { %201 = vst.msk [vmem:[#allocation3] sm:$0x3] %vm199_vm1, %v663_v2 }
  0x14 PF: > { %v291_v3 = vld [vmem:[%s817_s3 + $0x18] sm:$0xff]  ;;  %v664_v4 = vmov 0.0   ;;  %v290_v5 = vld [vmem:[%s817_s3 + $0x10] sm:$0xff]  ;;  %vm665_vm2 = vmmov 0   ;;  %v210_v8 = vld [vmem:[%s816_s2 + $0x28] sm:$0xff]  ;;  %s203_s23 = scalar_lea.vmem %s815_s1, %s706_s19  ;;  %vm213_vm3 = vcmask 261120   ;;  %v400_v32 = vlaneseq }
  0x15   : > { %608 = vmatprep.subr.mxu1 %v664_v4  ;;  %616 = vmatprep.mubr.msk.f32.mxu1 %vm665_vm2, %v664_v4  ;;  %v212_v6 = vld [vmem:[%s816_s2 + $0x38] sm:$0xff]  ;;  %v211_v7 = vld [vmem:[%s816_s2 + $0x30] sm:$0xff]  ;;  %v209_v9 = vld [vmem:[%s816_s2 + $0x20] sm:$0xff]  ;;  %s666_s26 = smov 96   ;;  %s667_s27 = smov 32   ;;  %vm433_vm8 = vcmask 253952  }
  0x16   : > { %609 = vmatpush3.msra.mxu1 %v291_v3  ;;  %241 = vmatprep.subr.mxu0 %v212_v6  ;;  %v289_v10 = vld [vmem:[%s817_s3 + $0x8] sm:$0xff]  ;;  %v208_v11 = vld [vmem:[%s816_s2 + $0x18] sm:$0xff]  ;;  %v207_v12 = vld [vmem:[%s816_s2 + $0x10] sm:$0xff]  ;;  %vm520_vm4 = vcmp.lt.s32.totalorder %v400_v32, 64  ;;  %s668_s28 = smov 64   ;;  %v401_v41 = vshrl.u32 %v400_v32, 7 }
  0x17   : > { %610 = vmatprep.subr.mxu1 %v664_v4  ;;  %242 = vmatpush1.msra.mxu0 %v211_v7  ;;  %v288_v13 = vld [vmem:[%s817_s3] sm:$0xff]  ;;  %v206_v14 = vld [vmem:[%s816_s2 + $0x8] sm:$0xff]  ;;  %v669_v38 = vmov 1966171168   ;;  %vm523_vm5 = vcmp.ge.s32.totalorder %v400_v32, 64  ;;  %vm524_vm6 = vcmp.lt.s32.totalorder %v400_v32, 96 }
  0x18   : > { %611 = vmatpush3.msra.mxu1 %v290_v5  ;;  %243 = vmatprep.subr.mxu0 %v210_v8  ;;  %v756_v15 = vld [vmem:[#allocation2] sm:$0x1]  ;;  %v398_v39 = vunpack.c.l.s4 %v669_v38  ;;  %vm525_vm7 = vmand %vm523_vm5, %vm524_vm6  ;;  %v418_v46 = vsub.s32 0, %v401_v41  ;;  %v438_v50 = vld [vmem:[%s818_s4 + $0x18] sm:$0xff]  ;;  %vm544_vm9 = vcmp.ge.s32.totalorder %v400_v32, 96  ;;  %vm545_vm10 = vcmp.lt.s32.totalorder %v400_v32, 128 }
  0x19   : > { %612 = vmatprep.subr.mxu1 %v664_v4  ;;  %244 = vmatpush1.msra.mxu0 %v209_v9  ;;  %v205_v16 = vld [vmem:[%s816_s2] sm:$0xff]  ;;  %v437_v51 = vld [vmem:[%s818_s4 + $0x10] sm:$0xff]  ;;  %v436_v52 = vld [vmem:[%s818_s4 + $0x8] sm:$0xff]  ;;  %s554_s14 = sshra.s32 %s706_s19, 3  ;;  %vm548_vm12 = vcmp.lt.s32.totalorder %v400_v32, 4  ;;  %s557_s15 = sand.u32 7, %s706_s19 }
  0x1a   : > { %613 = vmatpush3.msra.mxu1 %v289_v10  ;;  %245 = vmatprep.subr.mxu0 %v208_v11  ;;  %v204_v17 = vld [vmem:[%s203_s23] sm:$0x1]  ;;  %v399_v40 = vunpack.c.0.s8 %v398_v39  ;;  %vm546_vm11 = vmand %vm544_vm9, %vm545_vm10  ;;  %s597_s16 = sshll.u32 %s554_s14, 4  ;;  %vm552_vm13 = vcmp.lt.s32.totalorder %v400_v32, 256 }
  0x1b   : > { %614 = vmatprep.subr.mxu1 %v664_v4  ;;  %246 = vmatpush1.msra.mxu0 %v207_v12  ;;  %v435_v54 = vld [vmem:[%s818_s4] sm:$0xff]  ;;  %s560_s17 = sadd.s32 %s597_s16, %s557_s15 }
  0x1c   : > { %615 = vmatpush3.msra.mxu1 %v288_v13  ;;  %247 = vmatprep.subr.mxu0 %v206_v14  ;;  %v402_v42 = vsub.s32 %v399_v40, %v401_v41  ;;  %v439_v62 = vld [vmem:[%s818_s4 + $0x20] sm:$0x1]  ;;  %s561_s22 = scalar_lea.vmem %s819_s5, %s560_s17 }
  0x1d   : > { %617 = vmatmul.mubr.msk.f32.vlgmr.msra.gmra.mxu1 %vm213_vm3, %v756_v15  ;;  %248 = vmatpush1.msra.mxu0 %v205_v16 }
  0x1e   : > { %281 = vmatprep.mubr.f32.mxu0 %v664_v4  ;;  %619 = vmatprep.subr.mxu0 %v664_v4 }
  0x1f   : > { %588 = vmatmul.mubr.msk.f32.vlgmr.msra.gmra.mxu0 %vm213_vm3, %v204_v17 }
  0x20   : > { %627 = vmatprep.mubr.msk.f32.mxu0 %vm665_vm2, %v664_v4  ;;  %620 = vmatpush3.msra.mxu0 %v438_v50 }
  0x21   : > { %621 = vmatprep.subr.mxu0 %v664_v4 }
  0x22   : > { %622 = vmatpush3.msra.mxu0 %v437_v51 }
  0x23   : > { %623 = vmatprep.subr.mxu0 %v664_v4 }
  0x24   : > { %624 = vmatpush3.msra.mxu0 %v436_v52 }
  0x25   : > { %625 = vmatprep.subr.mxu0 %v664_v4 }
  0x26   : > { %626 = vmatpush3.msra.mxu0 %v435_v54 }
  0xdd   : > { %v361_v18 = vpop.f32.mrf.mxu1 }
  0xde   : > { %366 = vrot.lane.b32.xlu0 %v361_v18, %s666_s26 }
  0xdf   : > { %v618_v19 = vpop.f32.mrf.mxu1  ;;  %v283_v20 = vpop.f32.mrf.mxu0 }
  0xe1   : > { %v285_v21 = vpop.f32.mrf.mxu0 }
 0x150   : > { %v367_v22 = vpop.permute.xlu0 %366 }
 0x151   : > { %v369_v23 = vadd.f32 %v367_v22, %v283_v20  ;;  %v370_v24 = vadd.f32 %v367_v22, %v285_v21 }
 0x153   : > { %375 = vrot.lane.b32.xlu1 %v370_v24, %s667_s27  ;;  %373 = vrot.lane.b32.xlu0 %v369_v23, %s667_s27 }
 0x157   : > { %386 = vrot.lane.b32.xlu1 %v370_v24, %s666_s26 }
 0x1c5   : > { %v376_v25 = vpop.permute.xlu1 %375  ;;  %v374_v26 = vpop.permute.xlu0 %373 }
 0x1c6   : > { %v377_v27 = vsel %vm213_vm3, %v374_v26, %v376_v25 }
 0x1c7   : > { %v379_v28 = vadd.f32 %v377_v27, %v283_v20 }
 0x1c9   : > { %v590_v29 = vmul.f32 -1.442695, %v379_v28  ;;  %v387_v34 = vpop.permute.xlu1 %386 }
 0x1cb   : > { %645 = vpow2.f32 %v590_v29 }
 0x1d8   : > { %v646_v30 = vpop.eup %645 }
 0x1d9   : > { %v383_v31 = vadd.f32 1.0, %v646_v30 }
 0x1db   : > { %647 = vrcp.f32 %v383_v31 }
 0x1e8   : > { %v648_v33 = vpop.eup %647 }
 0x1e9   : > { %v389_v35 = vmul.f32 %v648_v33, %v387_v34  ;;  %522 = vst.msk [vmem:[#allocation3] sm:$0x1] %vm520_vm4, %v648_v33 }
 0x1eb   : > { %391 = vrot.lane.b32.xlu0 %v389_v35, %s668_s28 }
 0x25d   : > { %v392_v36 = vpop.permute.xlu0 %391 }
 0x25e   : > { %v394_v37 = vadd.f32 %v392_v36, %v283_v20 }
 0x260   : > { %649 = vtanh.f32 %v394_v37 }
 0x26d   : > { %v650_v43 = vpop.eup %649 }
 0x26e   : > { %v403_v44 = vrot.slane %v650_v43, %v402_v42  ;;  %526 = vst.msk [vmem:[#allocation3] sm:$0x1] %vm525_vm7, %v650_v43 }
 0x270   : > { %v410_v45 = vrot.slane %v403_v44, %v402_v42 }
 0x272   : > { %411 = vrot.lane.b32.xlu1 %v410_v45, %s668_s28 }
 0x2e4   : > { %v412_v47 = vpop.permute.xlu1 %411 }
 0x2e5   : > { %v414_v48 = vsub.f32 %v756_v15, %v412_v47 }
 0x2e7   : > { %v419_v49 = vrot.slane %v414_v48, %v418_v46 }
 0x2e9   : > { %420 = vrot.lane.b32.xlu0 %v419_v49, %s667_s27 }
 0x35b   : > { %v421_v53 = vpop.permute.xlu0 %420 }
 0x35c   : > { %v423_v55 = vmul.f32 %v648_v33, %v421_v53 }
 0x35e   : > { %425 = vrot.lane.b32.xlu1 %v423_v55, %s667_s27 }
 0x3d0   : > { %v426_v56 = vpop.permute.xlu1 %425 }
 0x3d1   : > { %v428_v57 = vadd.f32 %v650_v43, %v426_v56 }
 0x3d3   : > { %v533_v58 = vrot.slane %v428_v57, %v402_v42  ;;  %430 = vrot.lane.b32.xlu0 %v428_v57, %s668_s28 }
 0x3d5   : > { %v540_v59 = vrot.slane %v533_v58, %v402_v42 }
 0x3d7   : > { %541 = vrot.lane.b32.xlu1 %v540_v59, %s667_s27 }
 0x445   : > { %v431_v60 = vpop.permute.xlu0 %430 }
 0x446   : > { %434 = vst.msk [vmem:[#allocation2] sm:$0x1] %vm433_vm8, %v431_v60  ;;  %628 = vmatmul.mubr.msk.f32.vlgmr.msra.gmra.mxu0 %vm213_vm3, %v431_v60 }
 0x449   : > { %v542_v61 = vpop.permute.xlu1 %541 }
 0x44a   : > { %547 = vst.msk [vmem:[#allocation3] sm:$0x1] %vm546_vm11, %v542_v61 }
 0x506   : > { %v508_v63 = vpop.f32.mrf.mxu0 }
 0x507   : > { %v509_v0 = vadd.f32 %v508_v63, %v439_v62 }
 0x508   : > { %v629_v1 = vpop.f32.mrf.mxu0 }
 0x509   : > { %v592_v2 = vmul.f32 -1.442695, %v509_v0 }
 0x50b   : > { %651 = vpow2.f32 %v592_v2 }
 0x518   : > { %v652_v3 = vpop.eup %651 }
 0x519   : > { %v515_v4 = vadd.f32 1.0, %v652_v3 }
 0x51b   : > { %653 = vrcp.f32 %v515_v4 }
 0x528   : > { %v654_v5 = vpop.eup %653 }
 0x529   : > { %550 = vst.msk [vmem:[#allocation3 + $0x1] sm:$0x1] %vm548_vm12, %v654_v5 }
 0x530   : > { %v551_v6 = vld [vmem:[#allocation3] sm:$0x3] }
 0x531   : > { %562 = vst.msk [vmem:[%s561_s22] ss:$8 sm:$0x3] %vm552_vm13, %v551_v6 }
 0x532 PF: > { %s15_s18 = sadd.s32 1, %s661_s18  }
 0x533   : > { %p12_p4 = scmp.ge.s32.totalorder %s15_s18, 10  }
 0x535   :  { %14 = sbr.rel (!%p12_p4) target bundleno = 1 (0x1), region = 69 }

</bundles_post_ra>
